<compile_context>
chip_gen: v5e
topology: v5e:2x2
jax: 0.10.0
libtpu: 0.0.40
codegen_flags: <defaults>
</compile_context>

<pallas_src>
import math

import jax
import jax.numpy as jnp
from jax.experimental import pallas as pl
from jax.experimental.pallas import tpu as pltpu


def _round_up(x, m):
    return ((x + m - 1) // m) * m


def _resident_spec(shape, index_map):
    """Full-array, VMEM-resident block: constant index_map, single buffer."""
    try:
        return pl.BlockSpec(shape, index_map, pipeline_mode=pl.Buffered(1))
    except (TypeError, AttributeError):
        # Older API without pipeline_mode / Buffered: constant index_map alone
        # already prevents re-DMA between consecutive grid steps.
        return pl.BlockSpec(shape, index_map)


# ---------------------------------------------------------------------------
# Kernels
# ---------------------------------------------------------------------------
def _linear_resident_kernel(x_ref, w_ref, b_ref, o_ref):
    # x: (tm, Kp) bf16, w: (Kp, Np) bf16 (resident), b: (1, Np) f32.
    acc = jnp.dot(x_ref[...], w_ref[...], preferred_element_type=jnp.float32)
    o_ref[...] = (acc + b_ref[...]).astype(o_ref.dtype)


def _linear_kernel_kred(x_ref, w_ref, b_ref, o_ref, acc_ref):
    # grid = (M//tm, N//tn, K//tk); reduction axis (K) last / "arbitrary".
    @pl.when(pl.program_id(2) == 0)
    def _():
        # Fold the bias into the accumulator init (no epilogue add).
        acc_ref[...] = jnp.broadcast_to(b_ref[...], acc_ref.shape)

    acc_ref[...] += jnp.dot(
        x_ref[...], w_ref[...], preferred_element_type=jnp.float32
    )

    @pl.when(pl.program_id(2) == pl.num_programs(2) - 1)
    def _():
        o_ref[...] = acc_ref[...].astype(o_ref.dtype)


# ---------------------------------------------------------------------------
# Wrapper
# ---------------------------------------------------------------------------
def linear_pallas(x2d, w_kn, bias_row, *, n_out=None, out_dtype=None,
                  tm_target=256, tk_max=8192,
                  resident_weight_bytes=24 << 20):
    """out = x2d @ w_kn + bias (f32 accumulation).

    w_kn: (Kp, Np) — may already be layout-padded (extra rows/cols are zero).
    bias_row: (Np,) or (1, Np) float-ish.
    n_out: true output width (<= Np); output is sliced to (M, n_out).
    """
    M, K = x2d.shape
    Kp, Np = w_kn.shape
    assert Kp >= K
    n_out = Np if n_out is None else n_out
    out_dtype = out_dtype if out_dtype is not None else x2d.dtype

    # bf16 packs 16 rows per sublane group; keep loads/stores unmasked.
    sub = 16 if x2d.dtype == jnp.bfloat16 else 8
    tm = min(tm_target, _round_up(M, sub))
    Mp = _round_up(M, tm)
    gm = Mp // tm

    # Activations are tiny for this module — pad per call.
    xp = x2d
    if Mp != M or Kp != K:
        xp = jnp.pad(x2d, ((0, Mp - M), (0, Kp - K)))

    bias2d = jnp.asarray(bias_row, jnp.float32).reshape(1, -1)
    if bias2d.shape[1] != Np:
        bias2d = jnp.pad(bias2d, ((0, 0), (0, Np - bias2d.shape[1])))

    itemsize_x = jnp.dtype(xp.dtype).itemsize
    itemsize_w = jnp.dtype(w_kn.dtype).itemsize
    itemsize_o = jnp.dtype(out_dtype).itemsize
    w_bytes = Kp * Np * itemsize_w

    cost = pl.CostEstimate(
        flops=2 * M * K * n_out,
        transcendentals=0,
        bytes_accessed=(M * K * itemsize_x + w_bytes + M * n_out * itemsize_o),
    )

    if w_bytes <= resident_weight_bytes:
        # Weight-resident path: single weight DMA, grid over M only.
        x_tile_bytes = tm * Kp * itemsize_x
        out_tile_bytes = tm * Np * itemsize_o
        vmem_need = (w_bytes + bias2d.size * 4
                     + 2 * x_tile_bytes + 2 * out_tile_bytes)
        # Above the real need, above v5e's 16 MiB scoped default, and safely
        # below v7x's 64 MiB physical VMEM.
        vmem_limit = int(min(max(int(vmem_need * 1.25) + (2 << 20), 32 << 20),
                             48 << 20))

        out = pl.pallas_call(
            _linear_resident_kernel,
            out_shape=jax.ShapeDtypeStruct((Mp, Np), out_dtype),
            grid_spec=pltpu.PrefetchScalarGridSpec(
                num_scalar_prefetch=0,
                grid=(gm,),
                in_specs=[
                    pl.BlockSpec((tm, Kp), lambda i: (i, 0)),      # activations
                    _resident_spec((Kp, Np), lambda i: (0, 0)),    # weight (resident)
                    _resident_spec((1, Np), lambda i: (0, 0)),     # bias (resident)
                ],
                out_specs=pl.BlockSpec((tm, Np), lambda i: (i, 0)),
            ),
            compiler_params=pltpu.CompilerParams(
                dimension_semantics=("parallel",),
                vmem_limit_bytes=vmem_limit,
            ),
            cost_estimate=cost,
        )(xp, w_kn, bias2d)

        if Mp != M or Np != n_out:
            out = out[:M, :n_out]
        return out

    # ------------------------------------------------------------------
    # Fallback: weight too large to keep resident -> tiled GEMM with a
    # K-reduction grid axis (still f32 accumulation, bias in acc init).
    # ------------------------------------------------------------------
    tn = min(256, _round_up(Np, 128))
    nk = pl.cdiv(Kp, tk_max)
    tk = _round_up(pl.cdiv(Kp, nk), 128)
    Np2 = _round_up(Np, tn)
    Kp2 = _round_up(Kp, tk)

    wp = w_kn
    if (Kp2, Np2) != (Kp, Np):
        wp = jnp.pad(w_kn, ((0, Kp2 - Kp), (0, Np2 - Np)))
    if Kp2 != Kp:
        xp = jnp.pad(xp, ((0, 0), (0, Kp2 - Kp)))
    bp = bias2d
    if Np2 != Np:
        bp = jnp.pad(bias2d, ((0, 0), (0, Np2 - Np)))

    gm, gn, gk = Mp // tm, Np2 // tn, Kp2 // tk

    out = pl.pallas_call(
        _linear_kernel_kred,
        out_shape=jax.ShapeDtypeStruct((Mp, Np2), out_dtype),
        grid_spec=pltpu.PrefetchScalarGridSpec(
            num_scalar_prefetch=0,
            grid=(gm, gn, gk),
            in_specs=[
                pl.BlockSpec((tm, tk), lambda i, j, k: (i, k)),   # activations
                pl.BlockSpec((tk, tn), lambda i, j, k: (k, j)),   # weight (K, N)
                pl.BlockSpec((1, tn), lambda i, j, k: (0, j)),    # bias
            ],
            out_specs=pl.BlockSpec((tm, tn), lambda i, j, k: (i, j)),
            scratch_shapes=[pltpu.VMEM((tm, tn), jnp.float32)],
        ),
        compiler_params=pltpu.CompilerParams(
            dimension_semantics=("parallel", "parallel", "arbitrary"),
            vmem_limit_bytes=32 << 20,
        ),
        cost_estimate=cost,
    )(xp, wp, bp)

    return out[:M, :n_out]


class LLMResizePallas:
    """JAX/Pallas port of LLMResize: out = fc(x), fc = Linear(llm_size, sd_text_size)."""

    def __init__(self, llm_size=6656, sd_text_size=768, *, key,
                 param_dtype=jnp.bfloat16):
        k_w, k_b = jax.random.split(key)
        bound = 1.0 / math.sqrt(llm_size)
        # torch.nn.Linear init: U(-1/sqrt(in), 1/sqrt(in)) for weight and bias.
        w = jax.random.uniform(
            k_w, (llm_size, sd_text_size), jnp.float32, -bound, bound)
        b = jax.random.uniform(
            k_b, (sd_text_size,), jnp.float32, -bound, bound)

        # Pad + cast ONCE here (not per forward call): (K, N) layout, bf16,
        # K/N rounded to lane multiples; extra rows/cols are zero.
        Kp = _round_up(llm_size, 128)
        Np = _round_up(sd_text_size, 128)
        self.w_kn = jnp.pad(
            w, ((0, Kp - llm_size), (0, Np - sd_text_size))
        ).astype(param_dtype)
        self.bias2d = jnp.pad(
            b.reshape(1, -1), ((0, 0), (0, Np - sd_text_size))
        ).astype(jnp.float32)

        self.llm_size = llm_size
        self.sd_text_size = sd_text_size

    def __call__(self, x):
        lead_shape = x.shape[:-1]
        x2d = x.reshape(-1, self.llm_size).astype(self.w_kn.dtype)
        out2d = linear_pallas(
            x2d, self.w_kn, self.bias2d,
            n_out=self.sd_text_size, out_dtype=x.dtype)
        return out2d.reshape(*lead_shape, self.sd_text_size)


if __name__ == "__main__":
    # Small shapes consistent with the module:
    # (batch, seq, llm_size) -> (batch, seq, sd_text_size)
    batch, seq = 2, 8
    llm_size, sd_text_size = 512, 256

    key = jax.random.PRNGKey(0)
    k_param, k_x = jax.random.split(key)

    model = LLMResizePallas(llm_size, sd_text_size, key=k_param)
    x = jax.random.normal(k_x, (batch, seq, llm_size), jnp.float32)

    out = jax.block_until_ready(model(x))
    assert out.shape == (batch, seq, sd_text_size)
    assert out.dtype == x.dtype

    # Reference: same bf16 operands, f32 accumulation (matches kernel math).
    x2d_bf16 = x.reshape(-1, llm_size).astype(jnp.bfloat16)
    w_ref = model.w_kn[:llm_size, :sd_text_size]
    b_ref = model.bias2d[0, :sd_text_size]
    ref = (
        jnp.dot(x2d_bf16, w_ref, preferred_element_type=jnp.float32) + b_ref
    ).astype(x.dtype).reshape(batch, seq, sd_text_size)
    assert jnp.allclose(out, ref, atol=1e-2, rtol=1e-2)

    print("KERNEL_OK")
</pallas_src>

<mosaic_0001>
module attributes {stable_mosaic.version = 11 : i64} {
  func.func @_linear_resident_kernel(%arg0: i32, %arg1: memref<16x512xbf16, #tpu.memory_space<vmem>>, %arg2: memref<512x256xbf16, #tpu.memory_space<vmem>>, %arg3: memref<1x256xf32, #tpu.memory_space<vmem>>, %arg4: memref<16x256xf32, #tpu.memory_space<vmem>>) attributes {dimension_semantics = [#tpu.dimension_semantics<parallel>], iteration_bounds = array<i64: 1>, scalar_prefetch = 0 : i64, scratch_operands = 0 : i64, tpu.core_type = #tpu.core_type<tc>, window_params = [{transform_indices = @transform_0, window_bounds = array<i64: 16, 512>}, {pipeline_mode = #tpu.pipeline_mode<synchronous>, transform_indices = @transform_1, window_bounds = array<i64: 512, 256>}, {pipeline_mode = #tpu.pipeline_mode<synchronous>, transform_indices = @transform_2, window_bounds = array<i64: 1, 256>}, {transform_indices = @transform_3, window_bounds = array<i64: 16, 256>}]} {
    %c0 = arith.constant 0 : index
    %c0_0 = arith.constant 0 : index
    %0 = vector.load %arg1[%c0, %c0_0] : memref<16x512xbf16, #tpu.memory_space<vmem>>, vector<16x512xbf16>
    %c0_1 = arith.constant 0 : index
    %c0_2 = arith.constant 0 : index
    %1 = vector.load %arg2[%c0_1, %c0_2] : memref<512x256xbf16, #tpu.memory_space<vmem>>, vector<512x256xbf16>
    %cst = arith.constant dense<0.000000e+00> : vector<16x256xf32>
    %2 = tpu.matmul %0, %1, %cst {dimension_numbers = #tpu.dot_dimension_numbers<[1], [0], [0], [1], [0, 0, 1, 1], [], []>} : vector<16x512xbf16>, vector<512x256xbf16>, vector<16x256xf32> -> vector<16x256xf32>
    %c0_3 = arith.constant 0 : index
    %c0_4 = arith.constant 0 : index
    %3 = vector.load %arg3[%c0_3, %c0_4] : memref<1x256xf32, #tpu.memory_space<vmem>>, vector<1x256xf32>
    %4 = vector.broadcast %3 : vector<1x256xf32> to vector<16x256xf32>
    %5 = arith.addf %2, %4 : vector<16x256xf32>
    %c0_5 = arith.constant 0 : index
    %c0_6 = arith.constant 0 : index
    %6 = vector.load %arg4[%c0_5, %c0_6] : memref<16x256xf32, #tpu.memory_space<vmem>>, vector<16x256xf32>
    tpu.vector_store %arg4[%c0_5, %c0_6], %5 {strides = array<i32>} : memref<16x256xf32, #tpu.memory_space<vmem>>, vector<16x256xf32>,
    return
  }
  func.func @transform_0(%arg0: i32) -> (i32, i32) {
    %c0_i32 = arith.constant 0 : i32
    %c0_i32_0 = arith.constant 0 : i32
    return %arg0, %c0_i32 : i32, i32
  }
  func.func @transform_1(%arg0: i32) -> (i32, i32) {
    %c0_i32 = arith.constant 0 : i32
    %c0_i32_0 = arith.constant 0 : i32
    %c0_i32_1 = arith.constant 0 : i32
    return %c0_i32, %c0_i32_0 : i32, i32
  }
  func.func @transform_2(%arg0: i32) -> (i32, i32) {
    %c0_i32 = arith.constant 0 : i32
    %c0_i32_0 = arith.constant 0 : i32
    %c0_i32_1 = arith.constant 0 : i32
    return %c0_i32, %c0_i32_0 : i32, i32
  }
  func.func @transform_3(%arg0: i32) -> (i32, i32) {
    %c0_i32 = arith.constant 0 : i32
    %c0_i32_0 = arith.constant 0 : i32
    return %arg0, %c0_i32 : i32, i32
  }
}

</mosaic_0001>

<bundles_post_ra>
// kernel: tpu_custom_call.1
= control target key start
LH: loop header
LB: loop body
LE: loop exit
PB: predicated region body
PF: predicated region fallthrough
CT: control target
= control target key end

     0   :  { %8 = vsyncpa [#allocation3], 0  ;;  %s1122_s0 = inlined_call_operand.hbm [shape: bf16[16,512], index: 0, kind: input, shape index: {}]   ;;  %s1123_s1 = inlined_call_operand.hbm [shape: bf16[512,256], index: 1, kind: input, shape index: {}]   ;;  %s1124_s2 = inlined_call_operand.hbm [shape: f32[1,256], index: 2, kind: input, shape index: {}]   ;;  %s1125_s3 = inlined_call_operand.hbm [shape: f32[16,256], index: 3, kind: output, shape index: {}]  }
   0x1   :  { %9 = vsyncpa [#allocation6], 0  ;;  %s28_s14 = sshll.u32 %s1123_s1, 4  ;;  %s29_s14 = int_to_ptr.hbm [resolvable:$true] %s28_s14 }
   0x2   :  { %10 = vsyncpa [#allocation4], 0  ;;  %s1060_s15 = smov [#allocation5]   ;;  %s15_s19 = sshll.u32 %s1122_s0, 4  ;;  %s16_s19 = int_to_ptr.hbm [resolvable:$true] %s15_s19 }
   0x3   :  { %s30_s16 = sshll.u32 %s1060_s15, 4  ;;  %s1061_s20 = smov 128   ;;  %s31_s16 = int_to_ptr.vmem [resolvable:$true] %s30_s16 }
   0x4   :  { %s1062_s21 = smov 8   ;;  %s1063_s22 = smov [#allocation2]  }
   0x5   :  { %36 = dma.hbm_to_vmem [thread:$0]  %s29_s14, 8192, %s31_s16, [#allocation6], %s1061_s20, %s1061_s20, %s1062_s21  }
   0x6   :  { %s17_s23 = sshll.u32 %s1063_s22, 4  ;;  %s1064_s24 = smov 256   ;;  %s18_s23 = int_to_ptr.vmem [resolvable:$true] %s17_s23 }
   0x7   :  { %s1065_s25 = smov 16   ;;  %s42_s27 = sshll.u32 %s1124_s2, 4  ;;  %s43_s27 = int_to_ptr.hbm [resolvable:$true] %s42_s27 }
   0x8   :  { %23 = dma.hbm_to_vmem [thread:$0]  %s16_s19, 512, %s18_s23, [#allocation3], %s1064_s24, %s1064_s24, %s1065_s25  }
   0x9   :  { %s1066_s28 = smov [#allocation7]  }
   0xa   :  { %s44_s0 = sshll.u32 %s1066_s28, 4  ;;  %s45_s0 = int_to_ptr.vmem [resolvable:$true] %s44_s0 }
   0xb   :  { %47 = dma.hbm_to_vmem [thread:$0]  %s43_s27, 32, %s45_s0, [#allocation6]  }
   0xc   :  { %1054 = dma.done.wait [#allocation3], 512  }
   0xd   :  { %1055 = vsyncadd [#allocation3], 4294966784 }
   0xe   :  { %1056 = dma.done.wait [#allocation6], 8224  }
   0xf   :  { %1057 = vsyncadd [#allocation6], 4294959072  ;;  %v684_v0 = vld [vmem:[#allocation5 + $0x70] sm:$0xf]  ;;  %v901_v1 = vld [vmem:[#allocation5 + $0x74] sm:$0xf0] }
  0x10   :  { %v748_v2 = vld [vmem:[#allocation5 + $0xf0] sm:$0xf]  ;;  %v685_v3 = vor.u32 %v901_v1, %v684_v0  ;;  %v917_v4 = vld [vmem:[#allocation5 + $0xf4] sm:$0xf0]  ;;  %v676_v11 = vld [vmem:[#allocation5 + $0x60] sm:$0xf] }
  0x11   :  { %v812_v5 = vld [vmem:[#allocation5 + $0x170] sm:$0xf]  ;;  %v933_v6 = vld [vmem:[#allocation5 + $0x174] sm:$0xf0]  ;;  %v749_v7 = vor.u32 %v917_v4, %v748_v2  ;;  %v899_v13 = vld [vmem:[#allocation5 + $0x64] sm:$0xf0] }
  0x12   :  { %v813_v8 = vor.u32 %v933_v6, %v812_v5  ;;  %v876_v9 = vld [vmem:[#allocation5 + $0x1f0] sm:$0xf]  ;;  %v949_v10 = vld [vmem:[#allocation5 + $0x1f4] sm:$0xf0]  ;;  %474 = vmatpush.bf16.msra.mxu0 %v685_v3  ;;  %v740_v14 = vld [vmem:[#allocation5 + $0xe0] sm:$0xf]  ;;  %v677_v16 = vor.u32 %v899_v13, %v676_v11 }
  0x13   :  { %v877_v12 = vor.u32 %v949_v10, %v876_v9  ;;  %v915_v15 = vld [vmem:[#allocation5 + $0xe4] sm:$0xf0]  ;;  %488 = vmatpush.bf16.msra.mxu1 %v749_v7  ;;  %v804_v18 = vld [vmem:[#allocation5 + $0x160] sm:$0xf]  ;;  %v668_v23 = vld [vmem:[#allocation5 + $0x50] sm:$0xf] }
  0x14   :  { %502 = vmatpush.bf16.msra.mxu2 %v813_v8  ;;  %v741_v17 = vor.u32 %v915_v15, %v740_v14  ;;  %v931_v19 = vld [vmem:[#allocation5 + $0x164] sm:$0xf0]  ;;  %v868_v20 = vld [vmem:[#allocation5 + $0x1e0] sm:$0xf]  ;;  %v897_v24 = vld [vmem:[#allocation5 + $0x54] sm:$0xf0] }
  0x15   :  { %516 = vmatpush.bf16.msra.mxu3 %v877_v12  ;;  %v805_v21 = vor.u32 %v931_v19, %v804_v18  ;;  %v947_v22 = vld [vmem:[#allocation5 + $0x1e4] sm:$0xf0]  ;;  %v732_v26 = vld [vmem:[#allocation5 + $0xd0] sm:$0xf]  ;;  %v913_v27 = vld [vmem:[#allocation5 + $0xd4] sm:$0xf0]  ;;  %v669_v29 = vor.u32 %v897_v24, %v668_v23 }
  0x16   :  { %v869_v25 = vor.u32 %v947_v22, %v868_v20  ;;  %v796_v28 = vld [vmem:[#allocation5 + $0x150] sm:$0xf]  ;;  %475 = vmatpush.bf16.msra.mxu0 %v677_v16  ;;  %v929_v30 = vld [vmem:[#allocation5 + $0x154] sm:$0xf0]  ;;  %v733_v33 = vor.u32 %v913_v27, %v732_v26  ;;  %v660_v35 = vld [vmem:[#allocation5 + $0x40] sm:$0xf] }
  0x17   :  { %v860_v31 = vld [vmem:[#allocation5 + $0x1d0] sm:$0xf]  ;;  %v945_v32 = vld [vmem:[#allocation5 + $0x1d4] sm:$0xf0]  ;;  %489 = vmatpush.bf16.msra.mxu1 %v741_v17  ;;  %v797_v34 = vor.u32 %v929_v30, %v796_v28  ;;  %v895_v36 = vld [vmem:[#allocation5 + $0x44] sm:$0xf0] }
  0x18   :  { %503 = vmatpush.bf16.msra.mxu2 %v805_v21  ;;  %v724_v37 = vld [vmem:[#allocation5 + $0xc0] sm:$0xf]  ;;  %v861_v38 = vor.u32 %v945_v32, %v860_v31  ;;  %v911_v39 = vld [vmem:[#allocation5 + $0xc4] sm:$0xf0]  ;;  %v661_v44 = vor.u32 %v895_v36, %v660_v35  ;;  %v652_v47 = vld [vmem:[#allocation5 + $0x30] sm:$0xf] }
  0x19   :  { %517 = vmatpush.bf16.msra.mxu3 %v869_v25  ;;  %v788_v40 = vld [vmem:[#allocation5 + $0x140] sm:$0xf]  ;;  %v927_v41 = vld [vmem:[#allocation5 + $0x144] sm:$0xf0]  ;;  %v725_v45 = vor.u32 %v911_v39, %v724_v37  ;;  %v893_v48 = vld [vmem:[#allocation5 + $0x34] sm:$0xf0] }
  0x1a   :  { %v852_v42 = vld [vmem:[#allocation5 + $0x1c0] sm:$0xf]  ;;  %v943_v43 = vld [vmem:[#allocation5 + $0x1c4] sm:$0xf0]  ;;  %476 = vmatpush.bf16.msra.mxu0 %v669_v29  ;;  %v789_v46 = vor.u32 %v927_v41, %v788_v40  ;;  %v716_v49 = vld [vmem:[#allocation5 + $0xb0] sm:$0xf]  ;;  %v653_v56 = vor.u32 %v893_v48, %v652_v47 }
  0x1b   :  { %490 = vmatpush.bf16.msra.mxu1 %v733_v33  ;;  %v853_v50 = vor.u32 %v943_v43, %v852_v42  ;;  %v909_v51 = vld [vmem:[#allocation5 + $0xb4] sm:$0xf0]  ;;  %v780_v52 = vld [vmem:[#allocation5 + $0x130] sm:$0xf]  ;;  %v644_v59 = vld [vmem:[#allocation5 + $0x20] sm:$0xf] }
  0x1c   :  { %504 = vmatpush.bf16.msra.mxu2 %v797_v34  ;;  %v925_v53 = vld [vmem:[#allocation5 + $0x134] sm:$0xf0]  ;;  %v844_v54 = vld [vmem:[#allocation5 + $0x1b0] sm:$0xf]  ;;  %v717_v57 = vor.u32 %v909_v51, %v716_v49  ;;  %v891_v60 = vld [vmem:[#allocation5 + $0x24] sm:$0xf0] }
  0x1d   :  { %518 = vmatpush.bf16.msra.mxu3 %v861_v38  ;;  %v941_v55 = vld [vmem:[#allocation5 + $0x1b4] sm:$0xf0]  ;;  %v781_v58 = vor.u32 %v925_v53, %v780_v52  ;;  %v708_v61 = vld [vmem:[#allocation5 + $0xa0] sm:$0xf]  ;;  %v907_v63 = vld [vmem:[#allocation5 + $0xa4] sm:$0xf0]  ;;  %v645_v4 = vor.u32 %v891_v60, %v644_v59 }
  0x1e   :  { %477 = vmatpush.bf16.msra.mxu0 %v661_v44  ;;  %v845_v62 = vor.u32 %v941_v55, %v844_v54  ;;  %v772_v0 = vld [vmem:[#allocation5 + $0x120] sm:$0xf]  ;;  %v923_v1 = vld [vmem:[#allocation5 + $0x124] sm:$0xf0]  ;;  %v709_v5 = vor.u32 %v907_v63, %v708_v61  ;;  %v636_v7 = vld [vmem:[#allocation5 + $0x10] sm:$0xf] }
  0x1f   :  { %491 = vmatpush.bf16.msra.mxu1 %v725_v45  ;;  %v836_v2 = vld [vmem:[#allocation5 + $0x1a0] sm:$0xf]  ;;  %v939_v3 = vld [vmem:[#allocation5 + $0x1a4] sm:$0xf0]  ;;  %v773_v6 = vor.u32 %v923_v1, %v772_v0  ;;  %v889_v8 = vld [vmem:[#allocation5 + $0x14] sm:$0xf0] }
  0x20   :  { %505 = vmatpush.bf16.msra.mxu2 %v789_v46  ;;  %v700_v9 = vld [vmem:[#allocation5 + $0x90] sm:$0xf]  ;;  %v837_v10 = vor.u32 %v939_v3, %v836_v2  ;;  %v905_v11 = vld [vmem:[#allocation5 + $0x94] sm:$0xf0]  ;;  %v628_v16 = vld [vmem:[#allocation5] sm:$0xf]  ;;  %v637_v17 = vor.u32 %v889_v8, %v636_v7 }
  0x21   :  { %519 = vmatpush.bf16.msra.mxu3 %v853_v50  ;;  %v764_v12 = vld [vmem:[#allocation5 + $0x110] sm:$0xf]  ;;  %v921_v13 = vld [vmem:[#allocation5 + $0x114] sm:$0xf0]  ;;  %v887_v18 = vld [vmem:[#allocation5 + $0x4] sm:$0xf0]  ;;  %v701_v21 = vor.u32 %v905_v11, %v700_v9 }
  0x22   :  { %478 = vmatpush.bf16.msra.mxu0 %v653_v56  ;;  %v828_v14 = vld [vmem:[#allocation5 + $0x190] sm:$0xf]  ;;  %v937_v15 = vld [vmem:[#allocation5 + $0x194] sm:$0xf0]  ;;  %v692_v19 = vld [vmem:[#allocation5 + $0x80] sm:$0xf]  ;;  %v765_v22 = vor.u32 %v921_v13, %v764_v12  ;;  %v629_v33 = vor.u32 %v887_v18, %v628_v16 }
  0x23   :  { %492 = vmatpush.bf16.msra.mxu1 %v717_v57  ;;  %v903_v20 = vld [vmem:[#allocation5 + $0x84] sm:$0xf0]  ;;  %v756_v23 = vld [vmem:[#allocation5 + $0x100] sm:$0xf]  ;;  %v829_v26 = vor.u32 %v937_v15, %v828_v14  ;;  %v900_v28 = vld [vmem:[#allocation5 + $0x74] sm:$0xf] }
  0x24   :  { %506 = vmatpush.bf16.msra.mxu2 %v781_v58  ;;  %v919_v24 = vld [vmem:[#allocation5 + $0x104] sm:$0xf0]  ;;  %v820_v25 = vld [vmem:[#allocation5 + $0x180] sm:$0xf]  ;;  %v686_v29 = vld [vmem:[#allocation5 + $0x78] sm:$0xf0]  ;;  %v693_v37 = vor.u32 %v903_v20, %v692_v19 }
  0x25   :  { %520 = vmatpush.bf16.msra.mxu3 %v845_v62  ;;  %v935_v27 = vld [vmem:[#allocation5 + $0x184] sm:$0xf0]  ;;  %v916_v30 = vld [vmem:[#allocation5 + $0xf4] sm:$0xf]  ;;  %v750_v31 = vld [vmem:[#allocation5 + $0xf8] sm:$0xf0]  ;;  %v757_v38 = vor.u32 %v919_v24, %v756_v23  ;;  %v689_v44 = vor.u32 %v900_v28, %v686_v29 }
  0x26   :  { %479 = vmatpush.bf16.msra.mxu0 %v645_v4  ;;  %v932_v32 = vld [vmem:[#allocation5 + $0x174] sm:$0xf]  ;;  %v814_v34 = vld [vmem:[#allocation5 + $0x178] sm:$0xf0]  ;;  %v898_v39 = vld [vmem:[#allocation5 + $0x64] sm:$0xf]  ;;  %v821_v43 = vor.u32 %v935_v27, %v820_v25  ;;  %v753_v49 = vor.u32 %v916_v30, %v750_v31 }
  0x27   :  { %493 = vmatpush.bf16.msra.mxu1 %v709_v5  ;;  %v948_v35 = vld [vmem:[#allocation5 + $0x1f4] sm:$0xf]  ;;  %v878_v36 = vld [vmem:[#allocation5 + $0x1f8] sm:$0xf0]  ;;  %v678_v40 = vld [vmem:[#allocation5 + $0x68] sm:$0xf0]  ;;  %v817_v50 = vor.u32 %v932_v32, %v814_v34 }
  0x28   :  { %507 = vmatpush.bf16.msra.mxu2 %v773_v6  ;;  %v620_v41 = vld [vmem:[#allocation2 + $0x8] sm:$0xf]  ;;  %v885_v42 = vld [vmem:[#allocation2 + $0x14] sm:$0xf0]  ;;  %v914_v45 = vld [vmem:[#allocation5 + $0xe4] sm:$0xf]  ;;  %v881_v54 = vor.u32 %v948_v35, %v878_v36  ;;  %v681_v63 = vor.u32 %v898_v39, %v678_v40 }
  0x29   :  { %521 = vmatpush.bf16.msra.mxu3 %v837_v10  ;;  %v742_v46 = vld [vmem:[#allocation5 + $0xe8] sm:$0xf0]  ;;  %v930_v47 = vld [vmem:[#allocation5 + $0x164] sm:$0xf]  ;;  %v612_v51 = vld [vmem:[#allocation2] sm:$0xf]  ;;  %v1100_v55 = vor.u32 %v885_v42, %v620_v41 }
  0x2a   :  { %480 = vmatpush.bf16.msra.mxu0 %v637_v17  ;;  %v806_v48 = vld [vmem:[#allocation5 + $0x168] sm:$0xf0]  ;;  %v884_v52 = vld [vmem:[#allocation2 + $0xc] sm:$0xf0]  ;;  %v622_v56 = vld [vmem:[#allocation2 + $0x18] sm:$0xf0]  ;;  %v745_v1 = vor.u32 %v914_v45, %v742_v46 }
  0x2b   :  { %494 = vmatpush.bf16.msra.mxu1 %v701_v21  ;;  %v883_v53 = vld [vmem:[#allocation2 + $0xc] sm:$0xf]  ;;  %v882_v57 = vld [vmem:[#allocation2 + $0x4] sm:$0xf]  ;;  %v614_v58 = vld [vmem:[#allocation2 + $0x10] sm:$0xf0]  ;;  %v1102_v61 = vor.u32 %v884_v52, %v612_v51  ;;  %v809_v2 = vor.u32 %v930_v47, %v806_v48 }
  0x2c   :  { %508 = vmatpush.bf16.msra.mxu2 %v765_v22  ;;  %v946_v59 = vld [vmem:[#allocation5 + $0x1e4] sm:$0xf]  ;;  %v870_v60 = vld [vmem:[#allocation5 + $0x1e8] sm:$0xf0]  ;;  %v1104_v62 = vor.u32 %v883_v53, %v622_v56  ;;  %v1106_v0 = vor.u32 %v882_v57, %v614_v58  ;;  %v896_v3 = vld [vmem:[#allocation5 + $0x54] sm:$0xf] }
  0x2d   :  { %522 = vmatpush.bf16.msra.mxu3 %v829_v26  ;;  %v670_v4 = vld [vmem:[#allocation5 + $0x58] sm:$0xf0]  ;;  %v912_v5 = vld [vmem:[#allocation5 + $0xd4] sm:$0xf]  ;;  %v873_v6 = vor.u32 %v946_v59, %v870_v60  ;;  %v894_v15 = vld [vmem:[#allocation5 + $0x44] sm:$0xf] }
  0x2e   :  { %481 = vmatpush.bf16.msra.mxu0 %v629_v33  ;;  %v734_v7 = vld [vmem:[#allocation5 + $0xd8] sm:$0xf0]  ;;  %v928_v8 = vld [vmem:[#allocation5 + $0x154] sm:$0xf]  ;;  %v673_v12 = vor.u32 %v896_v3, %v670_v4  ;;  %v662_v16 = vld [vmem:[#allocation5 + $0x48] sm:$0xf0] }
  0x2f   :  { %495 = vmatpush.bf16.msra.mxu1 %v693_v37  ;;  %v798_v9 = vld [vmem:[#allocation5 + $0x158] sm:$0xf0]  ;;  %v944_v10 = vld [vmem:[#allocation5 + $0x1d4] sm:$0xf]  ;;  %v737_v13 = vor.u32 %v912_v5, %v734_v7  ;;  %v910_v17 = vld [vmem:[#allocation5 + $0xc4] sm:$0xf]  ;;  %v665_v24 = vor.u32 %v894_v15, %v662_v16 }
  0x30   :  { %509 = vmatpush.bf16.msra.mxu2 %v757_v38  ;;  %v862_v11 = vld [vmem:[#allocation5 + $0x1d8] sm:$0xf0]  ;;  %v801_v14 = vor.u32 %v928_v8, %v798_v9  ;;  %v726_v19 = vld [vmem:[#allocation5 + $0xc8] sm:$0xf0]  ;;  %v926_v20 = vld [vmem:[#allocation5 + $0x144] sm:$0xf] }
  0x31   :  { %523 = vmatpush.bf16.msra.mxu3 %v821_v43  ;;  %482 = vmatmul.bf16.vlgmr.msra.gmra.mxu0 %v1102_v61  ;;  %v865_v18 = vor.u32 %v944_v10, %v862_v11  ;;  %v790_v21 = vld [vmem:[#allocation5 + $0x148] sm:$0xf0]  ;;  %v942_v22 = vld [vmem:[#allocation5 + $0x1c4] sm:$0xf]  ;;  %v729_v25 = vor.u32 %v910_v17, %v726_v19  ;;  %v892_v27 = vld [vmem:[#allocation5 + $0x34] sm:$0xf] }
  0x32   :  { %530 = vmatpush.bf16.msrb.mxu0 %v689_v44  ;;  %496 = vmatmul.bf16.vlgmr.msra.gmra.mxu1 %v1106_v0  ;;  %v854_v23 = vld [vmem:[#allocation5 + $0x1c8] sm:$0xf0]  ;;  %v793_v26 = vor.u32 %v926_v20, %v790_v21  ;;  %v654_v28 = vld [vmem:[#allocation5 + $0x38] sm:$0xf0]  ;;  %v908_v29 = vld [vmem:[#allocation5 + $0xb4] sm:$0xf] }
  0x33   :  { %544 = vmatpush.bf16.msrb.mxu1 %v753_v49  ;;  %510 = vmatmul.bf16.vlgmr.msra.gmra.mxu2 %v1100_v55  ;;  %v857_v30 = vor.u32 %v942_v22, %v854_v23  ;;  %v718_v31 = vld [vmem:[#allocation5 + $0xb8] sm:$0xf0]  ;;  %v924_v32 = vld [vmem:[#allocation5 + $0x134] sm:$0xf]  ;;  %v657_v36 = vor.u32 %v892_v27, %v654_v28  ;;  %v890_v39 = vld [vmem:[#allocation5 + $0x24] sm:$0xf] }
  0x34   :  { %558 = vmatpush.bf16.msrb.mxu2 %v817_v50  ;;  %524 = vmatmul.bf16.vlgmr.msra.gmra.mxu3 %v1104_v62  ;;  %v782_v33 = vld [vmem:[#allocation5 + $0x138] sm:$0xf0]  ;;  %v940_v34 = vld [vmem:[#allocation5 + $0x1b4] sm:$0xf]  ;;  %v721_v37 = vor.u32 %v908_v29, %v718_v31  ;;  %v646_v40 = vld [vmem:[#allocation5 + $0x28] sm:$0xf0] }
  0x35   :  { %572 = vmatpush.bf16.msrb.mxu3 %v881_v54  ;;  %v846_v35 = vld [vmem:[#allocation5 + $0x1b8] sm:$0xf0]  ;;  %v785_v38 = vor.u32 %v924_v32, %v782_v33  ;;  %v906_v41 = vld [vmem:[#allocation5 + $0xa4] sm:$0xf]  ;;  %v710_v43 = vld [vmem:[#allocation5 + $0xa8] sm:$0xf0]  ;;  %v649_v48 = vor.u32 %v890_v39, %v646_v40 }
  0x36   :  { %531 = vmatpush.bf16.msrb.mxu0 %v681_v63  ;;  %v849_v42 = vor.u32 %v940_v34, %v846_v35  ;;  %v922_v44 = vld [vmem:[#allocation5 + $0x124] sm:$0xf]  ;;  %v774_v45 = vld [vmem:[#allocation5 + $0x128] sm:$0xf0]  ;;  %v713_v49 = vor.u32 %v906_v41, %v710_v43  ;;  %v888_v51 = vld [vmem:[#allocation5 + $0x14] sm:$0xf] }
  0x37   :  { %545 = vmatpush.bf16.msrb.mxu1 %v745_v1  ;;  %v938_v46 = vld [vmem:[#allocation5 + $0x1a4] sm:$0xf]  ;;  %v838_v47 = vld [vmem:[#allocation5 + $0x1a8] sm:$0xf0]  ;;  %v777_v50 = vor.u32 %v922_v44, %v774_v45  ;;  %v638_v52 = vld [vmem:[#allocation5 + $0x18] sm:$0xf0] }
  0x38   :  { %559 = vmatpush.bf16.msrb.mxu2 %v809_v2  ;;  %v904_v53 = vld [vmem:[#allocation5 + $0x94] sm:$0xf]  ;;  %v841_v54 = vor.u32 %v938_v46, %v838_v47  ;;  %v702_v56 = vld [vmem:[#allocation5 + $0x98] sm:$0xf0]  ;;  %v641_v63 = vor.u32 %v888_v51, %v638_v52  ;;  %v886_v3 = vld [vmem:[#allocation5 + $0x4] sm:$0xf] }
  0x39   :  { %573 = vmatpush.bf16.msrb.mxu3 %v873_v6  ;;  %v920_v57 = vld [vmem:[#allocation5 + $0x114] sm:$0xf]  ;;  %v766_v58 = vld [vmem:[#allocation5 + $0x118] sm:$0xf0]  ;;  %v705_v1 = vor.u32 %v904_v53, %v702_v56  ;;  %v630_v4 = vld [vmem:[#allocation5 + $0x8] sm:$0xf0] }
  0x3a   :  { %532 = vmatpush.bf16.msrb.mxu0 %v673_v12  ;;  %v936_v59 = vld [vmem:[#allocation5 + $0x194] sm:$0xf]  ;;  %v830_v60 = vld [vmem:[#allocation5 + $0x198] sm:$0xf0]  ;;  %v769_v2 = vor.u32 %v920_v57, %v766_v58  ;;  %v902_v5 = vld [vmem:[#allocation5 + $0x84] sm:$0xf]  ;;  %v633_v12 = vor.u32 %v886_v3, %v630_v4 }
  0x3b   :  { %546 = vmatpush.bf16.msrb.mxu1 %v737_v13  ;;  %v833_v6 = vor.u32 %v936_v59, %v830_v60  ;;  %v694_v7 = vld [vmem:[#allocation5 + $0x88] sm:$0xf0]  ;;  %v918_v8 = vld [vmem:[#allocation5 + $0x104] sm:$0xf]  ;;  %v128_v16 = vld [vmem:[#allocation7] sm:$0x3] }
  0x3c   :  { %560 = vmatpush.bf16.msrb.mxu2 %v801_v14  ;;  %v758_v9 = vld [vmem:[#allocation5 + $0x108] sm:$0xf0]  ;;  %v934_v10 = vld [vmem:[#allocation5 + $0x184] sm:$0xf]  ;;  %v697_v13 = vor.u32 %v902_v5, %v694_v7  ;;  %v130_v17 = vperm.slane %v128_v16, 0  ;;  %s1067_s2 = smov [#allocation8]  }
  0x3d   :  { %574 = vmatpush.bf16.msrb.mxu3 %v865_v18  ;;  %v822_v11 = vld [vmem:[#allocation5 + $0x188] sm:$0xf0]  ;;  %v761_v14 = vor.u32 %v918_v8, %v758_v9  ;;  %s594_s29 = sshll.u32 %s1067_s2, 4  ;;  %s596_s5 = sshll.u32 %s1125_s3, 4  ;;  %s595_s29 = int_to_ptr.vmem [resolvable:$true] %s594_s29  ;;  %s597_s5 = int_to_ptr.hbm [resolvable:$true] %s596_s5 }
  0x3e   :  { %533 = vmatpush.bf16.msrb.mxu0 %v665_v24  ;;  %v825_v15 = vor.u32 %v934_v10, %v822_v11 }
  0x3f   :  { %547 = vmatpush.bf16.msrb.mxu1 %v729_v25 }
  0x40   :  { %561 = vmatpush.bf16.msrb.mxu2 %v793_v26 }
  0x41   :  { %575 = vmatpush.bf16.msrb.mxu3 %v857_v30 }
  0x42   :  { %534 = vmatpush.bf16.msrb.mxu0 %v657_v36 }
  0x43   :  { %548 = vmatpush.bf16.msrb.mxu1 %v721_v37 }
  0x44   :  { %562 = vmatpush.bf16.msrb.mxu2 %v785_v38 }
  0x45   :  { %576 = vmatpush.bf16.msrb.mxu3 %v849_v42 }
  0x46   :  { %535 = vmatpush.bf16.msrb.mxu0 %v649_v48 }
  0x47   :  { %549 = vmatpush.bf16.msrb.mxu1 %v713_v49 }
  0x48   :  { %563 = vmatpush.bf16.msrb.mxu2 %v777_v50 }
  0x49   :  { %577 = vmatpush.bf16.msrb.mxu3 %v841_v54 }
  0x4a   :  { %536 = vmatpush.bf16.msrb.mxu0 %v641_v63 }
  0x4b   :  { %550 = vmatpush.bf16.msrb.mxu1 %v705_v1 }
  0x4c   :  { %564 = vmatpush.bf16.msrb.mxu2 %v769_v2 }
  0x4d   :  { %578 = vmatpush.bf16.msrb.mxu3 %v833_v6 }
  0x4e   :  { %537 = vmatpush.bf16.msrb.mxu0 %v633_v12 }
  0x4f   :  { %551 = vmatpush.bf16.msrb.mxu1 %v697_v13 }
  0x50   :  { %565 = vmatpush.bf16.msrb.mxu2 %v761_v14 }
  0x51   :  { %579 = vmatpush.bf16.msrb.mxu3 %v825_v15  ;;  %538 = vmatmul.bf16.vlgmr.msrb.gmra.mxu0 %v1102_v61 }
  0x52   :  { %552 = vmatmul.bf16.vlgmr.msrb.gmra.mxu1 %v1106_v0 }
  0x53   :  { %566 = vmatmul.bf16.vlgmr.msrb.gmra.mxu2 %v1100_v55 }
  0x54   :  { %580 = vmatmul.bf16.vlgmr.msrb.gmra.mxu3 %v1104_v62  ;;  %v131_v62 = vperm.slane %v128_v16, 1 }
  0xae   :  { %v483_v18 = vpop.f32.mrf.mxu0 }
  0xaf   :  { %v484_v19 = vadd.f32 %v483_v18, %v130_v17  ;;  %v497_v20 = vpop.f32.mrf.mxu1 }
  0xb1   :  { %v498_v21 = vadd.f32 %v497_v20, %v484_v19 }
  0xb6   :  { %v511_v22 = vpop.f32.mrf.mxu2  ;;  %v485_v26 = vpop.f32.mrf.mxu0 }
  0xb7   :  { %v512_v23 = vadd.f32 %v511_v22, %v498_v21  ;;  %v525_v24 = vpop.f32.mrf.mxu3  ;;  %v486_v27 = vadd.f32 %v485_v26, %v130_v17  ;;  %v499_v28 = vpop.f32.mrf.mxu1 }
  0xb9   :  { %v526_v25 = vadd.f32 %v525_v24, %v512_v23  ;;  %v500_v61 = vadd.f32 %v499_v28, %v486_v27 }
  0xbb   :  { %586 = vst [vmem:[#allocation8] sm:$0xff] %v526_v25 }
  0xbe   :  { %v513_v0 = vpop.f32.mrf.mxu2 }
  0xbf   :  { %v514_v29 = vadd.f32 %v513_v0, %v500_v61  ;;  %v527_v55 = vpop.f32.mrf.mxu3 }
  0xc1   :  { %v528_v30 = vadd.f32 %v527_v55, %v514_v29 }
  0xc3   :  { %588 = vst [vmem:[#allocation8 + $0x10] sm:$0xff] %v528_v30 }
  0xce   :  { %v539_v31 = vpop.f32.mrf.mxu0 }
  0xcf   :  { %v540_v32 = vadd.f32 %v539_v31, %v131_v62  ;;  %v553_v33 = vpop.f32.mrf.mxu1 }
  0xd1   :  { %v554_v34 = vadd.f32 %v553_v33, %v540_v32 }
  0xd6   :  { %v567_v35 = vpop.f32.mrf.mxu2  ;;  %v541_v38 = vpop.f32.mrf.mxu0 }
  0xd7   :  { %v568_v36 = vadd.f32 %v567_v35, %v554_v34  ;;  %v581_v37 = vpop.f32.mrf.mxu3  ;;  %v542_v40 = vadd.f32 %v541_v38, %v131_v62  ;;  %v555_v41 = vpop.f32.mrf.mxu1 }
  0xd9   :  { %v582_v39 = vadd.f32 %v581_v37, %v568_v36  ;;  %v556_v42 = vadd.f32 %v555_v41, %v542_v40 }
  0xdb   :  { %587 = vst [vmem:[#allocation8 + $0x8] sm:$0xff] %v582_v39 }
  0xde   :  { %v569_v43 = vpop.f32.mrf.mxu2 }
  0xdf   :  { %v570_v44 = vadd.f32 %v569_v43, %v556_v42  ;;  %v583_v45 = vpop.f32.mrf.mxu3 }
  0xe1   :  { %v584_v46 = vadd.f32 %v583_v45, %v570_v44 }
  0xe3   :  { %589 = vst [vmem:[#allocation8 + $0x18] sm:$0xff] %v584_v46 }
  0xe4   :  { %602 = dma.vmem_to_hbm [thread:$0]  %s595_s29, 512, %s597_s5, [#allocation4], %s1064_s24, %s1064_s24, %s1065_s25  }
  0xe5   :  { %1058 = dma.done.wait [#allocation4], 512  }
  0xe6   :  { %1059 = vsyncadd [#allocation4], 4294966784 }
  0xe7   :  { %607 = vsyncpa [#allocation3], 1 }
  0xe8   :  { %608 = vsyncpa [#allocation6], 1 }
  0xe9   :  { %609 = vsyncpa [#allocation4], 1 }

</bundles_post_ra>
